<compile_context>
chip_gen: v7x
topology: tpu7x:2x2x1
jax: 0.10.0
libtpu: 0.0.40
codegen_flags: <defaults>
</compile_context>

<pallas_src>
from functools import partial

import jax
import jax.numpy as jnp
from jax.experimental import pallas as pl
from jax.experimental.pallas import tpu as pltpu


# ---------------- configuration ----------------
PH, PW = 4, 4          # patch size
HIDDEN = 32            # embedding dim
NUM_LABELS = 10        # classification-task classes
NUM_DET_CLASSES = 9    # detection classes incl. class 0 = "no object"

SLAB_W = 128           # lane-dense packed output width
BOX_OFF = 16           # box columns   [BOX_OFF, BOX_OFF+4)
OBJ_OFF = 32           # objectness columns (duplicated det logits) [OBJ_OFF, OBJ_OFF+C)

assert NUM_DET_CLASSES <= BOX_OFF
assert BOX_OFF + 4 <= OBJ_OFF
assert OBJ_OFF + NUM_DET_CLASSES <= SLAB_W
assert NUM_LABELS <= SLAB_W


def is_task_bb(task):
    return task in ("bb", "detection", "object_detection")


def _tile_m(M):
    """Row tile: multiple of 8, capped at 1024; >=2 grid steps once M >= 16 (v7x megacore)."""
    if M <= 8:
        return 8
    half = -(-M // 2)            # ceil(M / 2) -> at least two grid steps
    t = -(-half // 8) * 8        # round up to a multiple of 8
    return min(t, 1024)


def _m_axis_semantics(grid_m):
    """Use CORE_PARALLEL on the M axis only on v7x (2 TCs/chip) with an even grid."""
    try:
        kind = jax.devices()[0].device_kind.lower()
    except Exception:  # pragma: no cover
        kind = ""
    if grid_m >= 2 and grid_m % 2 == 0 and ("v7" in kind or "7x" in kind):
        return (pltpu.CORE_PARALLEL,)
    return ("parallel",)


# ---------------- fused Pallas kernels ----------------
def _bb_fused_kernel(p_ref, w_ref, b_ref, o_ref):
    """Single MXU pass: (embed ∘ heads) folded into one (P, 128) weight, then epilogue.

    p_ref : (TM, P) patch rows, bf16        w_ref : (P, SLAB_W) composed weight, bf16
    b_ref : (1, SLAB_W) composed bias, f32  o_ref : (TM, SLAB_W) packed slab, f32
      lanes 0:C              det logits
      lanes BOX_OFF:+4       sigmoid boxes
      lanes OBJ_OFF:+C       objectness (det logits zeroed where argmax class == 0)
    """
    z = jnp.dot(p_ref[...], w_ref[...], preferred_element_type=jnp.float32) + b_ref[...]

    lane = jax.lax.broadcasted_iota(jnp.int32, z.shape, 1)
    det_mask = lane < NUM_DET_CLASSES
    box_mask = (lane >= BOX_OFF) & (lane < BOX_OFF + 4)
    dup_mask = (lane >= OBJ_OFF) & (lane < OBJ_OFF + NUM_DET_CLASSES)

    # sigmoid only on the box lanes (EUP); det / dup lanes untouched; f32 epilogue (v5e-safe)
    z = jnp.where(box_mask, jax.nn.sigmoid(z), z)

    # softmax dropped: argmax(softmax(x)) == argmax(x).  With first-index tie-break
    # (matches torch.argmax), argmax == 0  <=>  z[:, 0] >= max over det lanes.
    # TODO(synk): NaN det logits make this keep objectness; torch.argmax may differ under NaNs.
    det_vals = jnp.where(det_mask, z, -jnp.inf)
    maxv = jnp.max(det_vals, axis=-1, keepdims=True)          # (TM, 1)
    is_cls0 = z[:, 0:1] >= maxv                               # (TM, 1)

    # duplicated det lanes hold the objectness output: zero them where argmax == 0
    o_ref[...] = jnp.where(dup_mask & is_cls0, 0.0, z).astype(o_ref.dtype)


def _cls_fused_kernel(p_ref, w_ref, b_ref, o_ref):
    """Fused classification branch: mean-pool (commutes with the folded linear) + one matmul."""
    pooled = jnp.mean(p_ref[...], axis=1)                     # (TB, P) f32 pooling
    o_ref[...] = (jnp.dot(pooled.astype(w_ref.dtype), w_ref[...],
                          preferred_element_type=jnp.float32)
                  + b_ref[...]).astype(o_ref.dtype)


# ---------------- pallas_call wrappers ----------------
def bb_forward_fused(patches2d, w_comp, b_comp):
    M, P = patches2d.shape
    tm = _tile_m(M)
    grid_m = pl.cdiv(M, tm)
    m_pad = grid_m * tm
    if m_pad != M:
        patches2d = jnp.pad(patches2d, ((0, m_pad - M), (0, 0)))
    patches_bf16 = patches2d.astype(jnp.bfloat16)             # halve MXU-operand DMA bytes

    slab = pl.pallas_call(
        _bb_fused_kernel,
        out_shape=jax.ShapeDtypeStruct((m_pad, SLAB_W), jnp.float32),
        grid=(grid_m,),
        in_specs=[
            pl.BlockSpec((tm, P), lambda i: (i, 0)),
            pl.BlockSpec((P, SLAB_W), lambda i: (0, 0)),
            pl.BlockSpec((1, SLAB_W), lambda i: (0, 0)),
        ],
        out_specs=pl.BlockSpec((tm, SLAB_W), lambda i: (i, 0)),
        compiler_params=pltpu.CompilerParams(
            dimension_semantics=_m_axis_semantics(grid_m),
            vmem_limit_bytes=32 << 20,
        ),
    )(patches_bf16, w_comp, b_comp)
    return slab[:M] if m_pad != M else slab


def cls_forward_fused(patches3d, w_comp, b_comp):
    B, N, P = patches3d.shape
    tb = min(B, 512)
    grid_b = pl.cdiv(B, tb)
    b_pad = grid_b * tb
    if b_pad != B:
        patches3d = jnp.pad(patches3d, ((0, b_pad - B), (0, 0), (0, 0)))

    out = pl.pallas_call(
        _cls_fused_kernel,
        out_shape=jax.ShapeDtypeStruct((b_pad, SLAB_W), jnp.float32),
        grid=(grid_b,),
        in_specs=[
            pl.BlockSpec((tb, N, P), lambda i: (i, 0, 0)),
            pl.BlockSpec((P, SLAB_W), lambda i: (0, 0)),
            pl.BlockSpec((1, SLAB_W), lambda i: (0, 0)),
        ],
        out_specs=pl.BlockSpec((tb, SLAB_W), lambda i: (i, 0)),
        compiler_params=pltpu.CompilerParams(
            dimension_semantics=("parallel",),
            vmem_limit_bytes=32 << 20,
        ),
    )(patches3d, w_comp, b_comp)
    return out[:B] if b_pad != B else out


# ---------------- glue: patchify + parameters ----------------
def patchify(x, ph, pw):
    """NCHW -> (B, N, C*ph*pw); patch features flattened in (C, ph, pw) order.

    # TODO(synk): left as XLA glue (irrelevant at 16x16); fold into the kernel via an
    # index_map over patch rows (or accept NHWC) if H*W grows large.
    """
    B, C, H, W = x.shape
    x = x.reshape(B, C, H // ph, ph, W // pw, pw)
    x = jnp.transpose(x, (0, 2, 4, 1, 3, 5))
    return x.reshape(B, (H // ph) * (W // pw), C * ph * pw)


def init_params(key, in_channels):
    P = in_channels * PH * PW
    ks = jax.random.split(key, 8)
    s = 0.02
    return {
        "w_embed": s * jax.random.normal(ks[0], (P, HIDDEN), jnp.float32),
        "b_embed": s * jax.random.normal(ks[1], (HIDDEN,), jnp.float32),
        "w_cls":   s * jax.random.normal(ks[2], (HIDDEN, NUM_LABELS), jnp.float32),
        "b_cls":   s * jax.random.normal(ks[3], (NUM_LABELS,), jnp.float32),
        "w_det":   s * jax.random.normal(ks[4], (HIDDEN, NUM_DET_CLASSES), jnp.float32),
        "b_det":   s * jax.random.normal(ks[5], (NUM_DET_CLASSES,), jnp.float32),
        "w_box":   s * jax.random.normal(ks[6], (HIDDEN, 4), jnp.float32),
        "b_box":   s * jax.random.normal(ks[7], (4,), jnp.float32),
    }


def pack_detection_heads(params):
    """Concatenate det / box / duplicated-det heads into one lane-dense (H, 128) weight."""
    w = jnp.zeros((HIDDEN, SLAB_W), jnp.float32)
    w = w.at[:, :NUM_DET_CLASSES].set(params["w_det"])
    w = w.at[:, BOX_OFF:BOX_OFF + 4].set(params["w_box"])
    w = w.at[:, OBJ_OFF:OBJ_OFF + NUM_DET_CLASSES].set(params["w_det"])
    b = jnp.zeros((1, SLAB_W), jnp.float32)
    b = b.at[:, :NUM_DET_CLASSES].set(params["b_det"])
    b = b.at[:, BOX_OFF:BOX_OFF + 4].set(params["b_box"])
    b = b.at[:, OBJ_OFF:OBJ_OFF + NUM_DET_CLASSES].set(params["b_det"])
    return w, b


def pack_cls_head(params):
    w = jnp.zeros((HIDDEN, SLAB_W), jnp.float32).at[:, :NUM_LABELS].set(params["w_cls"])
    b = jnp.zeros((1, SLAB_W), jnp.float32).at[:, :NUM_LABELS].set(params["b_cls"])
    return w, b


def prepare_params(params):
    """One-time host-side packing + algebraic composition (embed ∘ heads).

    No nonlinearity sits between the patch-embed and the heads, so
        (p @ We + be) @ Wh + bh == p @ (We @ Wh) + (be @ Wh + bh)
    Composed weights are stored in bf16 (MXU operands); biases stay f32.
    """
    w_det_pack, b_det_pack = pack_detection_heads(params)
    w_cls_pack, b_cls_pack = pack_cls_head(params)
    be = params["b_embed"].reshape(1, -1)
    w_bb = params["w_embed"] @ w_det_pack                      # (P, 128)
    b_bb = be @ w_det_pack + b_det_pack                        # (1, 128)
    w_cls = params["w_embed"] @ w_cls_pack                     # (P, 128)
    b_cls = be @ w_cls_pack + b_cls_pack                       # (1, 128)
    return {
        "w_bb": w_bb.astype(jnp.bfloat16), "b_bb": b_bb.astype(jnp.float32),
        "w_cls": w_cls.astype(jnp.bfloat16), "b_cls": b_cls.astype(jnp.float32),
    }


# ---------------- HF.forward equivalent ----------------
@partial(jax.jit, static_argnames=("task",))
def hf_forward(prep, x, task):
    B = x.shape[0]
    patches = patchify(x, PH, PW)                              # (B, N, P)
    N, P = patches.shape[1], patches.shape[2]

    if is_task_bb(task):
        slab = bb_forward_fused(patches.reshape(B * N, P), prep["w_bb"], prep["b_bb"])
        slab = slab.reshape(B, N, SLAB_W)
        out_clf = slab[:, :8, :NUM_DET_CLASSES]                # logits[:, :8]
        out_bb = slab[:8, :, BOX_OFF:BOX_OFF + 4]              # pred_boxes[:8]
        out_objn = slab[:, :8, OBJ_OFF:OBJ_OFF + NUM_DET_CLASSES]
        if out_clf.shape[-1] == 1:                             # .squeeze(dim=-1) of the original
            out_clf = jnp.squeeze(out_clf, axis=-1)
            out_objn = jnp.squeeze(out_objn, axis=-1)
        return out_clf, out_bb, out_objn

    # classification task: return out['logits']
    logits = cls_forward_fused(patches, prep["w_cls"], prep["b_cls"])
    return logits[:, :NUM_LABELS]


# ---------------- main ----------------
if __name__ == "__main__":
    key = jax.random.PRNGKey(0)
    kx, kp = jax.random.split(key)
    x = jax.random.normal(kx, (2, 4, 16, 16), jnp.float32)     # NCHW pixel_values
    params = init_params(kp, in_channels=4)
    prep = prepare_params(params)                              # hoisted: computed once

    # bb (detection) task path
    out_clf, out_bb, out_objn = hf_forward(prep, x, task="bb")
    jax.block_until_ready((out_clf, out_bb, out_objn))
    assert out_clf.shape == (2, 8, NUM_DET_CLASSES)
    assert out_bb.shape == (2, 16, 4)
    assert out_objn.shape == (2, 8, NUM_DET_CLASSES)

    # plain classification task path (returns logits)
    logits = hf_forward(prep, x, task="classification")
    jax.block_until_ready(logits)
    assert logits.shape == (2, NUM_LABELS)

    # ---- pure-JAX reference (structural sanity check; loose tol for bf16 MXU feed) ----
    patches = patchify(x, PH, PW)
    hidden = patches @ params["w_embed"] + params["b_embed"]
    det = hidden @ params["w_det"] + params["b_det"]
    box = jax.nn.sigmoid(hidden @ params["w_box"] + params["b_box"])
    ref_clf = det[:, :8]
    ref_bb = box[:8]
    ref_logits = jnp.mean(hidden, axis=1) @ params["w_cls"] + params["b_cls"]

    assert bool(jnp.allclose(out_clf, ref_clf, atol=5e-3, rtol=5e-3))
    assert bool(jnp.allclose(out_bb, ref_bb, atol=5e-3, rtol=5e-3))
    assert bool(jnp.allclose(logits, ref_logits, atol=5e-3, rtol=5e-3))

    # objectness logic checked against the kernel's own logits (avoids argmax-tie sensitivity)
    clfs_k = jnp.argmax(out_clf, axis=-1)
    objn_from_kernel_logits = jnp.where((clfs_k != 0)[..., None], out_clf, 0.0)
    assert bool(jnp.allclose(out_objn, objn_from_kernel_logits, atol=1e-6))

    print("KERNEL_OK")
</pallas_src>

<mosaic_0001>
module attributes {stable_mosaic.version = 11 : i64} {
  func.func @_bb_fused_kernel(%arg0: i32, %arg1: memref<16x64xbf16, #tpu.memory_space<vmem>>, %arg2: memref<64x128xbf16, #tpu.memory_space<vmem>>, %arg3: memref<1x128xf32, #tpu.memory_space<vmem>>, %arg4: memref<16x128xf32, #tpu.memory_space<vmem>>) attributes {dimension_semantics = [#tpu.dimension_semantics<parallel>], iteration_bounds = array<i64: 2>, scalar_prefetch = 0 : i64, scratch_operands = 0 : i64, tpu.core_type = #tpu.core_type<tc>, window_params = [{transform_indices = @transform_0, window_bounds = array<i64: 16, 64>}, {pipeline_mode = #tpu.pipeline_mode<synchronous>, transform_indices = @transform_1, window_bounds = array<i64: 64, 128>}, {pipeline_mode = #tpu.pipeline_mode<synchronous>, transform_indices = @transform_2, window_bounds = array<i64: 1, 128>}, {transform_indices = @transform_3, window_bounds = array<i64: 16, 128>}]} {
    %c0 = arith.constant 0 : index
    %c0_0 = arith.constant 0 : index
    %0 = vector.load %arg1[%c0, %c0_0] : memref<16x64xbf16, #tpu.memory_space<vmem>>, vector<16x64xbf16>
    %c0_1 = arith.constant 0 : index
    %c0_2 = arith.constant 0 : index
    %1 = vector.load %arg2[%c0_1, %c0_2] : memref<64x128xbf16, #tpu.memory_space<vmem>>, vector<64x128xbf16>
    %cst = arith.constant dense<0.000000e+00> : vector<16x128xf32>
    %2 = tpu.matmul %0, %1, %cst {dimension_numbers = #tpu.dot_dimension_numbers<[1], [0], [0], [1], [0, 0, 1, 1], [], []>} : vector<16x64xbf16>, vector<64x128xbf16>, vector<16x128xf32> -> vector<16x128xf32>
    %c0_3 = arith.constant 0 : index
    %c0_4 = arith.constant 0 : index
    %3 = vector.load %arg3[%c0_3, %c0_4] : memref<1x128xf32, #tpu.memory_space<vmem>>, vector<1x128xf32>
    %4 = vector.broadcast %3 : vector<1x128xf32> to vector<16x128xf32>
    %5 = arith.addf %2, %4 : vector<16x128xf32>
    %6 = tpu.iota {dimensions = array<i32: 1>} : vector<16x128xi32>
    %c9_i32 = arith.constant 9 : i32
    %7 = vector.broadcast %c9_i32 : i32 to vector<16x128xi32>
    %8 = arith.cmpi slt, %6, %7 : vector<16x128xi32>
    %c16_i32 = arith.constant 16 : i32
    %9 = vector.broadcast %c16_i32 : i32 to vector<16x128xi32>
    %10 = arith.cmpi sge, %6, %9 : vector<16x128xi32>
    %c20_i32 = arith.constant 20 : i32
    %11 = vector.broadcast %c20_i32 : i32 to vector<16x128xi32>
    %12 = arith.cmpi slt, %6, %11 : vector<16x128xi32>
    %13 = arith.andi %10, %12 : vector<16x128xi1>
    %c32_i32 = arith.constant 32 : i32
    %14 = vector.broadcast %c32_i32 : i32 to vector<16x128xi32>
    %15 = arith.cmpi sge, %6, %14 : vector<16x128xi32>
    %c41_i32 = arith.constant 41 : i32
    %16 = vector.broadcast %c41_i32 : i32 to vector<16x128xi32>
    %17 = arith.cmpi slt, %6, %16 : vector<16x128xi32>
    %18 = arith.andi %15, %17 : vector<16x128xi1>
    %19 = arith.negf %5 : vector<16x128xf32>
    %20 = math.exp %19 : vector<16x128xf32>
    %cst_5 = arith.constant 1.000000e+00 : f32
    %21 = vector.broadcast %cst_5 : f32 to vector<16x128xf32>
    %22 = arith.addf %21, %20 : vector<16x128xf32>
    %23 = arith.divf %21, %22 : vector<16x128xf32>
    %24 = arith.select %13, %23, %5 : vector<16x128xi1>, vector<16x128xf32>
    %cst_6 = arith.constant 0xFF800000 : f32
    %25 = vector.broadcast %cst_6 : f32 to vector<16x128xf32>
    %26 = arith.select %8, %24, %25 : vector<16x128xi1>, vector<16x128xf32>
    %cst_7 = arith.constant dense<0xFF800000> : vector<16xf32>
    %27 = vector.multi_reduction <maximumf>, %26, %cst_7 [1] : vector<16x128xf32> to vector<16xf32>
    %28 = vector.shape_cast %27 : vector<16xf32> to vector<16x1xf32>
    %29 = vector.extract_strided_slice %24 {offsets = [0, 0], sizes = [16, 1], strides = [1, 1]} : vector<16x128xf32> to vector<16x1xf32>
    %30 = arith.cmpf oge, %29, %28 : vector<16x1xf32>
    %31 = vector.broadcast %30 : vector<16x1xi1> to vector<16x128xi1>
    %32 = arith.andi %18, %31 : vector<16x128xi1>
    %cst_8 = arith.constant 0.000000e+00 : f32
    %33 = vector.broadcast %cst_8 : f32 to vector<16x128xf32>
    %34 = arith.select %32, %33, %24 : vector<16x128xi1>, vector<16x128xf32>
    %c0_9 = arith.constant 0 : index
    %c0_10 = arith.constant 0 : index
    %35 = vector.load %arg4[%c0_9, %c0_10] : memref<16x128xf32, #tpu.memory_space<vmem>>, vector<16x128xf32>
    tpu.vector_store %arg4[%c0_9, %c0_10], %34 {strides = array<i32>} : memref<16x128xf32, #tpu.memory_space<vmem>>, vector<16x128xf32>,
    return
  }
  func.func @transform_0(%arg0: i32) -> (i32, i32) {
    %c0_i32 = arith.constant 0 : i32
    %c0_i32_0 = arith.constant 0 : i32
    return %arg0, %c0_i32 : i32, i32
  }
  func.func @transform_1(%arg0: i32) -> (i32, i32) {
    %c0_i32 = arith.constant 0 : i32
    %c0_i32_0 = arith.constant 0 : i32
    %c0_i32_1 = arith.constant 0 : i32
    return %c0_i32, %c0_i32_0 : i32, i32
  }
  func.func @transform_2(%arg0: i32) -> (i32, i32) {
    %c0_i32 = arith.constant 0 : i32
    %c0_i32_0 = arith.constant 0 : i32
    %c0_i32_1 = arith.constant 0 : i32
    return %c0_i32, %c0_i32_0 : i32, i32
  }
  func.func @transform_3(%arg0: i32) -> (i32, i32) {
    %c0_i32 = arith.constant 0 : i32
    %c0_i32_0 = arith.constant 0 : i32
    return %arg0, %c0_i32 : i32, i32
  }
}

</mosaic_0001>

<bundles_post_ra>
// kernel: hf_forward.1
= control target key start
LH: loop header
LB: loop body
LE: loop exit
PB: predicated region body
PF: predicated region fallthrough
CT: control target
= control target key end

     0   :  { %s463_s12 = smov 0   ;;  %s499_s0 = inlined_call_operand.vmem [shape: bf16[32,64], index: 0, kind: input, shape index: {}]   ;;  %s500_s1 = inlined_call_operand.vmem [shape: bf16[64,128], index: 1, kind: input, shape index: {}]   ;;  %s501_s2 = inlined_call_operand.vmem [shape: f32[1,128], index: 2, kind: input, shape index: {}]   ;;  %s502_s3 = inlined_call_operand.vmem [shape: f32[32,128], index: 3, kind: output, shape index: {}]  }
   0x1 LB: > { %s369_s13 = sadd.s32 4294967295, %s438_s12   ;;  %p373_p0 = scmp.ge.s32.totalorder %s438_s12, 1  ;;  %s438_s12 = sphi %s463_s12, %s13_s12  }
   0x2   : > { %p138_p1 = scmp.lt.s32.totalorder %s438_s12, 3 }
   0x4   : > { %p139_p2 = pnand %p373_p0, %p138_p1 }
   0x5   : > { %v419_v0 = vld [vmem:[%s500_s1] sm:$0xff] (!%p139_p2)   ;;  %v440_v1 = vmov (!%p139_p2), 0.0   ;;  %v420_v2 = vld [vmem:[%s500_s1 + $0x8] sm:$0xff] (!%p139_p2)   ;;  %vm441_vm0 = vmmov (!%p139_p2), 0   ;;  %s374_s18 = sshll.u32 (!%p139_p2), %s369_s13, 1  ;;  %v421_v3 = vld [vmem:[%s500_s1 + $0x10] sm:$0xff] (!%p139_p2)   ;;  %v266_v16 = vlaneseq (!%p139_p2) }
   0x6   : > { %142 = sbr.rel (%p139_p2) target bundleno = 544 (0x220), region = 32  ;;  %394 = vmatprep.subr.bf16.mxu0 (!%p139_p2), %v440_v1  ;;  %402 = vmatprep.mubr.msk.bf16.mxu0 (!%p139_p2), %vm441_vm0, %v440_v1  ;;  %p163_p3 = scmp.lt.s32.totalorder (!%p139_p2), %s374_s18, 3  ;;  %v422_v4 = vld [vmem:[%s500_s1 + $0x18] sm:$0xff] (!%p139_p2)   ;;  %vm221_vm1 = vcmask (!%p139_p2), 523264   ;;  %v378_v6 = vld [vmem:[%s501_s2] ss:$0 sm:$0xff] (!%p139_p2) }
   0x7   : > { %395 = vmatpush3.bf16.msra.mxu0 (!%p139_p2), %v419_v0  ;;  %v267_v20 = vand.u32 (!%p139_p2), 127, %v266_v16  ;;  %v442_v27 = vmov (!%p139_p2), 0  }
   0x8   : > { %396 = vmatprep.subr.bf16.mxu0 (!%p139_p2), %v440_v1  ;;  %417 = vset.pattern.permute.xlu1 (!%p139_p2), %v442_v27 }
   0x9   : > { %vm269_vm2 = vcmp.ge.s32.totalorder (!%p139_p2), %v267_v20, 16  ;;  %vm270_vm3 = vcmp.lt.s32.totalorder (!%p139_p2), %v267_v20, 20  ;;  %vm268_vm5 = vcmp.lt.s32.totalorder (!%p139_p2), %v267_v20, 9  ;;  %418 = vset.pattern.permute.xlu0 (!%p139_p2), %v442_v27  ;;  %vm272_vm8 = vcmp.ge.s32.totalorder (!%p139_p2), %v267_v20, 32 }
   0xa   : > { %vm271_vm4 = vmand (!%p139_p2), %vm269_vm2, %vm270_vm3  ;;  %vm273_vm9 = vcmp.lt.s32.totalorder (!%p139_p2), %v267_v20, 41 }
   0xb   : > { %397 = vmatpush3.bf16.msra.mxu0 (!%p139_p2), %v420_v2  ;;  %vm274_vm10 = vmand (!%p139_p2), %vm272_vm8, %vm273_vm9 }
   0xc   : > { %398 = vmatprep.subr.bf16.mxu0 (!%p139_p2), %v440_v1 }
   0xd   : > { %s504_s18 = smov (!%p163_p3, %s374_s18), 3 }
   0xe   : > { %s375_s21 = sshll.u32 %s504_s18, 2  ;;  %s377_s29 = sshll.u32 %s504_s18, 3 }
   0xf   : > { %s166_s24 = scalar_lea.vmem %s499_s0, %s375_s21  ;;  %399 = vmatpush3.bf16.msra.mxu0 %v421_v3  ;;  %s172_s5 = scalar_lea.vmem %s502_s3, %s377_s29 }
  0x10   : > { %400 = vmatprep.subr.bf16.mxu0 %v440_v1  ;;  %v423_v5 = vld [vmem:[%s166_s24] sm:$0xff]  }
  0x13   : > { %401 = vmatpush3.bf16.msra.mxu0 %v422_v4 }
  0x16   : > { %403 = vmatmul.mubr.msk.bf16.vlgmr.msra.gmra.mrb[0].mxu0 %vm221_vm1, %v423_v5 }
  0xe9   : > { %v259_v7 = vpop.f32.mrb[0].mxu0 }
  0xea   : > { %v260_v8 = vadd.f32 %v378_v6, %v259_v7  ;;  %v404_v9 = vpop.f32.mrb[1].mxu0 }
  0xeb   : > { %v262_v10 = vpop.f32.mrb[2].mxu0 }
  0xec   : > { %v385_v11 = vmul.f32 -1.442695, %v260_v8  ;;  %v263_v12 = vadd.f32 %v378_v6, %v262_v10  ;;  %v405_v13 = vpop.f32.mrb[3].mxu0 }
  0xee   : > { %424 = vpow2.f32 %v385_v11  ;;  %v386_v14 = vmul.f32 -1.442695, %v263_v12 }
  0xf0   : > { %426 = vpow2.f32 %v386_v14 }
  0xf8   : > { %v425_v15 = vpop.eup %424 }
  0xf9   : > { %v281_v17 = vadd.f32 1.0, %v425_v15 }
  0xfa   : > { %v427_v18 = vpop.eup %426 }
  0xfb   : > { %428 = vrcp.f32 %v281_v17  ;;  %v282_v19 = vadd.f32 1.0, %v427_v18 }
  0xfd   : > { %430 = vrcp.f32 %v282_v19 }
 0x105   : > { %v429_v21 = vpop.eup %428 }
 0x106   : > { %v287_v22 = vsel %vm271_vm4, %v429_v21, %v260_v8 }
 0x107   : > { %v431_v23 = vpop.eup %430  ;;  %v289_v24 = vsel %vm268_vm5, %v287_v22, -inf }
 0x108   : > { %291 = vmax.xlane.f32.xlu0 %v289_v24  ;;  %v288_v25 = vsel %vm271_vm4, %v431_v23, %v263_v12 }
 0x109   : > { %v290_v26 = vsel %vm268_vm5, %v288_v25, -inf }
 0x10c   : > { %293 = vmax.xlane.f32.xlu0 %v290_v26 }
 0x195   : > { %v292_v28 = vpop.xlane.xlu0 %291 }
 0x196   : > { %vm295_vm6 = vcmp.ge.f32.partialorder %v287_v22, %v292_v28 }
 0x197   : > { %v297_v29 = vsel %vm295_vm6, 1, %v442_v27 }
 0x198   : > { %300 = vperm.xlu1 %417, %v297_v29  }
 0x199   : > { %v294_v30 = vpop.xlane.xlu0 %293 }
 0x19a   : > { %vm296_vm7 = vcmp.ge.f32.partialorder %v288_v25, %v294_v30 }
 0x19b   : > { %v298_v31 = vsel %vm296_vm7, 1, %v442_v27 }
 0x19c   : > { %303 = vperm.xlu1 %417, %v298_v31  }
 0x217   : > { %v301_v32 = vpop.permute.xlu1 %300 }
 0x218   : > { %vm305_vm11 = vcmp.eq.s32.totalorder %v301_v32, 1 }
 0x219   : > { %vm307_vm12 = vmand %vm274_vm10, %vm305_vm11 }
 0x21a   : > { %v309_v33 = vsel %vm307_vm12, 0.0, %v287_v22 }
 0x21b   : > { %311 = vst [vmem:[%s172_s5] sm:$0xff] %v309_v33  ;;  %v304_v34 = vpop.permute.xlu1 %303 }
 0x21c   : > { %vm306_vm13 = vcmp.eq.s32.totalorder %v304_v34, 1 }
 0x21d   : > { %vm308_vm14 = vmand %vm274_vm10, %vm306_vm13 }
 0x21e   : > { %v310_v35 = vsel %vm308_vm14, 0.0, %v288_v25 }
 0x21f   : > { %312 = vst [vmem:[%s172_s5 + $0x8] sm:$0xff] %v310_v35 }
 0x220 PF: > { %s13_s12 = sadd.s32 1, %s438_s12  }
 0x221   : > { %p10_p4 = scmp.ge.s32.totalorder %s13_s12, 4  }
 0x223   :  { %12 = sbr.rel (!%p10_p4) target bundleno = 1 (0x1), region = 62 }

</bundles_post_ra>
